<compile_context>
chip_gen: v7x
topology: tpu7x:2x2x1
jax: 0.10.0
libtpu: 0.0.40
codegen_flags: <defaults>
</compile_context>

<pallas_src>
import functools

import jax
import jax.numpy as jnp
import numpy as np
from jax import lax
from jax.experimental import pallas as pl
from jax.experimental.pallas import tpu as pltpu


def _kept_kdkh_pairs(kD, kH, mask_type):
    """Static list of (kd, kh) taps left nonzero by the PixelCNN mask.

    The mask is constant over kw / Cin / Cout, so it reduces to a (kd, kh) keep-set.
    """
    assert mask_type in {"A", "B"}
    keep = np.ones((kD, kH), dtype=bool)
    keep[kD // 2, kH // 2 + (mask_type == "B"):] = False
    keep[kD // 2 + 1:, :] = False
    return [(kd, kh) for kd in range(kD) for kh in range(kH) if keep[kd, kh]]


def build_mask_np(weight_shape, mask_type):
    """Full 5-D mask (numpy, static). Only needed by the reference check."""
    assert mask_type in {"A", "B"}
    _, _, kD, kH, _ = weight_shape
    m = np.ones(weight_shape, np.float32)
    m[:, :, kD // 2, kH // 2 + (mask_type == "B"):, :] = 0.0
    m[:, :, kD // 2 + 1:, :, :] = 0.0
    return m


def _masked_conv3d_kernel(x_ref, w_ref, b_ref, o_ref, *, tD, Ho, WpC, pairs):
    """One (sample, D-tile) per grid step.

    x_ref : (tD + max_kd, Hp, Wp*Cin)   padded input, channels merged into lanes (bf16)
    w_ref : (n_pairs*Wp*Cin, Wo*Cout)   banded weight (kw taps + wo mapping folded in)
    b_ref : (1, Wo*Cout)                f32 bias, tiled over wo
    o_ref : (tD*Ho, Wo*Cout)            output tile
    """
    # im2col over the statically nonzero (kd, kh) taps. Each piece only slices the
    # leading / sublane dims (lane axis untouched); the reshape is a pure sublane
    # fold since Ho is a multiple of 8. Concatenating along K gives ONE MXU matmul.
    lhs_parts = []
    for kd, kh in pairs:                                   # static unroll, 4-5 taps
        patch = x_ref[kd:kd + tD, kh:kh + Ho, :]           # (tD, Ho, Wp*Cin)
        lhs_parts.append(patch.reshape(tD * Ho, WpC))
    lhs = jnp.concatenate(lhs_parts, axis=1)               # (tD*Ho, n_pairs*Wp*Cin)

    acc = jnp.dot(lhs, w_ref[...],
                  preferred_element_type=jnp.float32)      # single MXU pass, f32 acc
    acc = acc + b_ref[...]                                 # f32 epilogue (v5e friendly)
    o_ref[...] = acc.astype(o_ref.dtype)


def masked_conv3d(x, weight, bias, mask_type="A", padding=(1, 1, 1),
                  tile_d=4, compute_dtype=jnp.bfloat16,
                  vmem_budget_bytes=40 * 1024 * 1024):
    """x: (N, Cin, D, H, W) float32 (PyTorch NCDHW). Returns (N, Cout, Do, Ho, Wo)."""
    N, Cin, D, H, W = x.shape
    Cout, Cin_w, kD, kH, kW = weight.shape
    assert Cin_w == Cin
    pD, pH, pW = padding
    Dp, Hp, Wp = D + 2 * pD, H + 2 * pH, W + 2 * pW
    Do, Ho, Wo = Dp - kD + 1, Hp - kH + 1, Wp - kW + 1
    WpC = Wp * Cin
    WoC = Wo * Cout

    # ---- static mask -> kept taps (skip the taps that are provably zero) -----------
    pairs = _kept_kdkh_pairs(kD, kH, mask_type)
    n_pairs = len(pairs)
    max_kd = max(kd for kd, _ in pairs)

    # ---- pick the D tile: largest divisor of Do whose double-buffered footprint fits
    # the VMEM budget (re-derived for v7x's 64 MiB VMEM; weight/bias stay resident). --
    in_row_bytes = Hp * WpC * jnp.dtype(compute_dtype).itemsize
    out_row_bytes = Ho * WoC * jnp.dtype(x.dtype).itemsize
    w_bytes = n_pairs * WpC * WoC * jnp.dtype(compute_dtype).itemsize
    tD = 1
    for cand in range(min(tile_d, Do), 0, -1):
        if Do % cand:
            continue
        fp = 2 * (cand + max_kd) * in_row_bytes + 2 * cand * Ho * out_row_bytes // Ho \
            + w_bytes
        if fp <= vmem_budget_bytes:
            tD = cand
            break
    nT = Do // tD
    tDp = tD + max_kd

    # ---- input layout: NCDHW -> padded channels-last with W*Cin merged on lanes ----
    x_cl = jnp.transpose(x, (0, 2, 3, 4, 1))                         # (N, D, H, W, Cin)
    x_cl = jnp.pad(x_cl, ((0, 0), (pD, pD), (pH, pH), (pW, pW), (0, 0)))
    x_cl = x_cl.reshape(N, Dp, Hp, WpC)
    # D tiles with their (max_kd)-row halo, pre-materialized so BlockSpec indexing
    # stays block-aligned (duplication factor only (tD+max_kd)/tD).
    # TODO(synk): an Element-indexed BlockSpec over Dp would avoid the halo copy.
    win_idx = np.arange(nT)[:, None] * tD + np.arange(tDp)[None, :]  # (nT, tDp) static
    x_win = x_cl[:, win_idx].astype(compute_dtype)                   # (N,nT,tDp,Hp,WpC)

    # ---- banded weight: fold kw taps and the wo->w mapping into one matrix ---------
    # Wb[p*Wp*Cin + (wo+kw)*Cin + cin, wo*Cout + cout] = weight[cout, cin, kd_p, kh_p, kw]
    kd_idx = np.array([p[0] for p in pairs])
    kh_idx = np.array([p[1] for p in pairs])
    w_sel = jnp.transpose(weight, (2, 3, 4, 1, 0))[kd_idx, kh_idx]   # (np, kW, Cin, Cout)
    t_i, wo_i, kw_i, ci_i, co_i = np.meshgrid(
        np.arange(n_pairs), np.arange(Wo), np.arange(kW),
        np.arange(Cin), np.arange(Cout), indexing="ij")
    rows = t_i * WpC + (wo_i + kw_i) * Cin + ci_i                    # static numpy
    cols = wo_i * Cout + co_i
    vals = w_sel[t_i, kw_i, ci_i, co_i]                              # (np,Wo,kW,Cin,Cout)
    w_band = jnp.zeros((n_pairs * WpC, WoC), compute_dtype)
    w_band = w_band.at[rows, cols].set(vals.astype(compute_dtype))

    b_tiled = jnp.tile(bias.astype(jnp.float32), Wo).reshape(1, WoC)  # f32 epilogue

    kernel = functools.partial(_masked_conv3d_kernel,
                               tD=tD, Ho=Ho, WpC=WpC, pairs=tuple(pairs))

    out_raw = pl.pallas_call(
        kernel,
        out_shape=jax.ShapeDtypeStruct((N, nT, tD * Ho, WoC), x.dtype),
        grid_spec=pltpu.PrefetchScalarGridSpec(
            num_scalar_prefetch=0,
            grid=(N, nT),
            in_specs=[
                # one padded (sample, D-tile) per grid step (leading dims squeezed)
                pl.BlockSpec((None, None, tDp, Hp, WpC), lambda n, t: (n, t, 0, 0, 0)),
                # banded weight and bias: resident for every grid step
                pl.BlockSpec((n_pairs * WpC, WoC), lambda n, t: (0, 0)),
                pl.BlockSpec((1, WoC), lambda n, t: (0, 0)),
            ],
            out_specs=pl.BlockSpec((None, None, tD * Ho, WoC),
                                   lambda n, t: (n, t, 0, 0)),
        ),
        compiler_params=pltpu.CompilerParams(
            dimension_semantics=("parallel", "parallel"),
            vmem_limit_bytes=48 * 1024 * 1024),
    )(x_win, w_band, b_tiled)

    # layout plumbing back to NCDHW
    out = out_raw.reshape(N, nT, tD, Ho, Wo, Cout).reshape(N, Do, Ho, Wo, Cout)
    return jnp.transpose(out, (0, 4, 1, 2, 3))


def reference_conv3d(x, weight, bias, mask_type, padding=(1, 1, 1),
                     compute_dtype=jnp.bfloat16):
    """lax reference with the same operand rounding (bf16 operands, f32 accumulate)."""
    w_masked = weight * jnp.asarray(build_mask_np(weight.shape, mask_type))
    x_r = x.astype(compute_dtype).astype(jnp.float32)
    w_r = w_masked.astype(compute_dtype).astype(jnp.float32)
    out = lax.conv_general_dilated(
        x_r, w_r, window_strides=(1, 1, 1),
        padding=[(p, p) for p in padding],
        dimension_numbers=("NCDHW", "OIDHW", "NCDHW"),
        precision=lax.Precision.HIGHEST)
    return out + bias.reshape(1, -1, 1, 1, 1)


if __name__ == "__main__":
    key = jax.random.PRNGKey(0)
    kx, kw, kb = jax.random.split(key, 3)

    N, Cin, Cout = 2, 4, 4
    D = H = W = 8
    kD = kH = kW = 3

    x = jax.random.normal(kx, (N, Cin, D, H, W), dtype=jnp.float32)
    weight = 0.1 * jax.random.normal(kw, (Cout, Cin, kD, kH, kW), dtype=jnp.float32)
    bias = 0.1 * jax.random.normal(kb, (Cout,), dtype=jnp.float32)

    ok = True
    for mask_type in ("A", "B"):
        out = jax.block_until_ready(
            masked_conv3d(x, weight, bias, mask_type=mask_type, padding=(1, 1, 1)))
        ref = jax.block_until_ready(
            reference_conv3d(x, weight, bias, mask_type, padding=(1, 1, 1)))
        if not np.allclose(np.asarray(out), np.asarray(ref), atol=1e-3, rtol=1e-3):
            ok = False

    assert ok, "Pallas masked conv3d does not match lax reference"
    print("KERNEL_OK")
</pallas_src>

<mosaic_0001>
module attributes {stable_mosaic.version = 11 : i64} {
  func.func @_masked_conv3d_kernel(%arg0: i32, %arg1: i32, %arg2: memref<1x1x5x10x40xbf16, #tpu.memory_space<vmem>>, %arg3: memref<160x32xbf16, #tpu.memory_space<vmem>>, %arg4: memref<1x32xf32, #tpu.memory_space<vmem>>, %arg5: memref<1x1x32x32xf32, #tpu.memory_space<vmem>>) attributes {dimension_semantics = [#tpu.dimension_semantics<parallel>, #tpu.dimension_semantics<parallel>], iteration_bounds = array<i64: 2, 2>, scalar_prefetch = 0 : i64, scratch_operands = 0 : i64, tpu.core_type = #tpu.core_type<tc>, window_params = [{transform_indices = @transform_0, window_bounds = array<i64: 1, 1, 5, 10, 40>}, {pipeline_mode = #tpu.pipeline_mode<synchronous>, transform_indices = @transform_1, window_bounds = array<i64: 160, 32>}, {pipeline_mode = #tpu.pipeline_mode<synchronous>, transform_indices = @transform_2, window_bounds = array<i64: 1, 32>}, {transform_indices = @transform_3, window_bounds = array<i64: 1, 1, 32, 32>}]} {
    %c0 = arith.constant 0 : index
    %c0_0 = arith.constant 0 : index
    %c0_1 = arith.constant 0 : index
    %c0_2 = arith.constant 0 : index
    %c0_3 = arith.constant 0 : index
    %0 = vector.load %arg2[%c0, %c0_0, %c0_1, %c0_2, %c0_3] : memref<1x1x5x10x40xbf16, #tpu.memory_space<vmem>>, vector<1x1x4x8x40xbf16>
    %1 = vector.shape_cast %0 : vector<1x1x4x8x40xbf16> to vector<4x8x40xbf16>
    %2 = vector.shape_cast %1 : vector<4x8x40xbf16> to vector<32x40xbf16>
    %c0_4 = arith.constant 0 : index
    %c0_5 = arith.constant 0 : index
    %c0_6 = arith.constant 0 : index
    %c1 = arith.constant 1 : index
    %c0_7 = arith.constant 0 : index
    %3 = vector.load %arg2[%c0_4, %c0_5, %c0_6, %c1, %c0_7] : memref<1x1x5x10x40xbf16, #tpu.memory_space<vmem>>, vector<1x1x4x8x40xbf16>
    %4 = vector.shape_cast %3 : vector<1x1x4x8x40xbf16> to vector<4x8x40xbf16>
    %5 = vector.shape_cast %4 : vector<4x8x40xbf16> to vector<32x40xbf16>
    %c0_8 = arith.constant 0 : index
    %c0_9 = arith.constant 0 : index
    %c0_10 = arith.constant 0 : index
    %c2 = arith.constant 2 : index
    %c0_11 = arith.constant 0 : index
    %6 = vector.load %arg2[%c0_8, %c0_9, %c0_10, %c2, %c0_11] : memref<1x1x5x10x40xbf16, #tpu.memory_space<vmem>>, vector<1x1x4x8x40xbf16>
    %7 = vector.shape_cast %6 : vector<1x1x4x8x40xbf16> to vector<4x8x40xbf16>
    %8 = vector.shape_cast %7 : vector<4x8x40xbf16> to vector<32x40xbf16>
    %c0_12 = arith.constant 0 : index
    %c0_13 = arith.constant 0 : index
    %c1_14 = arith.constant 1 : index
    %c0_15 = arith.constant 0 : index
    %c0_16 = arith.constant 0 : index
    %9 = vector.load %arg2[%c0_12, %c0_13, %c1_14, %c0_15, %c0_16] : memref<1x1x5x10x40xbf16, #tpu.memory_space<vmem>>, vector<1x1x4x8x40xbf16>
    %10 = vector.shape_cast %9 : vector<1x1x4x8x40xbf16> to vector<4x8x40xbf16>
    %11 = vector.shape_cast %10 : vector<4x8x40xbf16> to vector<32x40xbf16>
    %12 = tpu.concatenate %2, %5, %8, %11 in 1 : vector<32x40xbf16>, vector<32x40xbf16>, vector<32x40xbf16>, vector<32x40xbf16> -> vector<32x160xbf16>
    %c0_17 = arith.constant 0 : index
    %c0_18 = arith.constant 0 : index
    %13 = vector.load %arg3[%c0_17, %c0_18] : memref<160x32xbf16, #tpu.memory_space<vmem>>, vector<160x32xbf16>
    %cst = arith.constant dense<0.000000e+00> : vector<32x32xf32>
    %14 = tpu.matmul %12, %13, %cst {dimension_numbers = #tpu.dot_dimension_numbers<[1], [0], [0], [1], [0, 0, 1, 1], [], []>} : vector<32x160xbf16>, vector<160x32xbf16>, vector<32x32xf32> -> vector<32x32xf32>
    %c0_19 = arith.constant 0 : index
    %c0_20 = arith.constant 0 : index
    %15 = vector.load %arg4[%c0_19, %c0_20] : memref<1x32xf32, #tpu.memory_space<vmem>>, vector<1x32xf32>
    %16 = vector.broadcast %15 : vector<1x32xf32> to vector<32x32xf32>
    %17 = arith.addf %14, %16 : vector<32x32xf32>
    %c0_21 = arith.constant 0 : index
    %c0_22 = arith.constant 0 : index
    %c0_23 = arith.constant 0 : index
    %c0_24 = arith.constant 0 : index
    %18 = vector.load %arg5[%c0_21, %c0_22, %c0_23, %c0_24] : memref<1x1x32x32xf32, #tpu.memory_space<vmem>>, vector<1x1x32x32xf32>
    %19 = vector.shape_cast %18 : vector<1x1x32x32xf32> to vector<32x32xf32>
    %20 = vector.shape_cast %17 : vector<32x32xf32> to vector<1x1x32x32xf32>
    tpu.vector_store %arg5[%c0_21, %c0_22, %c0_23, %c0_24], %20 {strides = array<i32>} : memref<1x1x32x32xf32, #tpu.memory_space<vmem>>, vector<1x1x32x32xf32>,
    return
  }
  func.func @transform_0(%arg0: i32, %arg1: i32) -> (i32, i32, i32, i32, i32) {
    %c0_i32 = arith.constant 0 : i32
    %c0_i32_0 = arith.constant 0 : i32
    %c0_i32_1 = arith.constant 0 : i32
    %c0_i32_2 = arith.constant 0 : i32
    return %arg0, %arg1, %c0_i32, %c0_i32_0, %c0_i32_1 : i32, i32, i32, i32, i32
  }
  func.func @transform_1(%arg0: i32, %arg1: i32) -> (i32, i32) {
    %c0_i32 = arith.constant 0 : i32
    %c0_i32_0 = arith.constant 0 : i32
    %c0_i32_1 = arith.constant 0 : i32
    return %c0_i32, %c0_i32_0 : i32, i32
  }
  func.func @transform_2(%arg0: i32, %arg1: i32) -> (i32, i32) {
    %c0_i32 = arith.constant 0 : i32
    %c0_i32_0 = arith.constant 0 : i32
    %c0_i32_1 = arith.constant 0 : i32
    return %c0_i32, %c0_i32_0 : i32, i32
  }
  func.func @transform_3(%arg0: i32, %arg1: i32) -> (i32, i32, i32, i32) {
    %c0_i32 = arith.constant 0 : i32
    %c0_i32_0 = arith.constant 0 : i32
    %c0_i32_1 = arith.constant 0 : i32
    return %arg0, %arg1, %c0_i32, %c0_i32_0 : i32, i32, i32, i32
  }
}

</mosaic_0001>

<bundles_post_ra>
// kernel: tpu_custom_call.1
= control target key start
LH: loop header
LB: loop body
LE: loop exit
PB: predicated region body
PF: predicated region fallthrough
CT: control target
= control target key end

     0   :  { %8 = vsyncpa [#allocation3], 0  ;;  %s1152_s0 = inlined_call_operand.vmem [shape: bf16[2,2,5,10,40], index: 0, kind: input, shape index: {}]   ;;  %s1153_s1 = inlined_call_operand.vmem [shape: bf16[160,32], index: 1, kind: input, shape index: {}]   ;;  %s1154_s2 = inlined_call_operand.vmem [shape: f32[1,32], index: 2, kind: input, shape index: {}]   ;;  %s1155_s3 = inlined_call_operand.hbm [shape: f32[2,2,32,32], index: 3, kind: output, shape index: {}]  }
   0x1   :  { %10 = vsyncpa [#allocation3 + $0x1], 0  ;;  %s888_s12 = smov 0   ;;  %s890_s13 = smov 0  }
   0x2   :  { %s892_s14 = smov 0   ;;  %s894_s15 = smov 0  }
   0x3   :  { %s896_s16 = smov 0   ;;  %s898_s17 = smov 0  }
   0x4   :  { %s900_s18 = smov 0   ;;  %s902_s19 = smov 0  }
   0x5 LB: > { %s610_s20 = sadd.s32 4294967295, %s859_s19   ;;  %s611_s21 = sadd.s32 4294967294, %s859_s19   ;;  %s859_s19 = sphi %s902_s19, %s16_s19   ;;  %s855_s18 = sphi %s900_s18, %s1168_s18   ;;  %s851_s17 = sphi %s898_s17, %s1167_s17   ;;  %s847_s16 = sphi %s896_s16, %s1166_s16   ;;  %s843_s15 = sphi %s894_s15, %s1165_s15   ;;  %s839_s14 = sphi %s892_s14, %s1164_s14   ;;  %s835_s13 = sphi %s890_s13, %s1163_s13   ;;  %s831_s12 = sphi %s888_s12, %s1162_s12  }
   0x6   : > { %s25_s22 = sadd.s32 1, %s851_s17  ;;  %s28_s23 = sadd.s32 1, %s855_s18 }
   0x7   : > { %p26_p0 = scmp.ge.s32.totalorder %s25_s22, 2  ;;  %p117_p1 = scmp.ne.s32.totalorder %s839_s14, %s835_s13 }
   0x8   : > { %p118_p2 = scmp.eq.s32.totalorder %s610_s20, 3  ;;  %p123_p5 = scmp.ne.s32.totalorder %s835_s13, %s831_s12 }
   0x9   : > { %s1170_s22 = smov (%p26_p0, %s25_s22), 0  ;;  %s1172_s23 = smov (!%p26_p0, %s28_s23), %s855_s18 }
   0xa   : > { %s103_s24 = ssub.s32 %s851_s17, %s1170_s22  ;;  %p939_p3 = por %p118_p2, %p117_p1 }
   0xb   : > { %p30_p4 = scmp.ge.s32.totalorder %s1172_s23, 2  ;;  %p124_p6 = scmp.eq.s32.totalorder %s611_s21, 3 }
   0xc   : > { %p614_p7 = scmp.ge.s32.totalorder %s859_s19, 1  ;;  %p160_p9 = scmp.lt.s32.totalorder %s859_s19, 5 }
   0xd   : > { %s1174_s23 = smov (%p30_p4, %s1172_s23), 0  ;;  %p948_p8 = por %p124_p6, %p123_p5 }
   0xe   : > { %s102_s27 = ssub.s32 %s855_s18, %s1174_s23  ;;  %s107_s28 = sadd.s32 1, %s839_s14 }
   0xf   : > { %s104_s29 = sor.u32 %s103_s24, %s102_s27  ;;  %p161_p10 = pnand %p614_p7, %p160_p9 }
  0x10   : > { %p105_p11 = scmp.eq.s32.totalorder %s104_s29, 0  ;;  %p188_p12 = scmp.lt.s32.totalorder (!%p161_p10), %s847_s16, 1  ;;  %v753_v0 = vld [vmem:[%s1153_s1] sm:$0xff] (!%p161_p10)   ;;  %v861_v1 = vmov (!%p161_p10), 0   ;;  %v754_v2 = vld [vmem:[%s1153_s1 + $0x8] sm:$0xff] (!%p161_p10)   ;;  %vm277_vm0 = vcmask (!%p161_p10), 1042432  }
  0x11   : > { %164 = sbr.rel (%p161_p10) target bundleno = 404 (0x194), region = 32  ;;  %p190_p13 = scmp.lt.s32.totalorder (!%p161_p10), %s843_s15, 1  ;;  %652 = vmatprep.subr.bf16.mxu1 (!%p161_p10), %v861_v1  ;;  %456 = vmatprep.subr.bf16.mxu0 (!%p161_p10), %v861_v1  ;;  %vm278_vm1 = vcmask (!%p161_p10), 1046532   ;;  %vm206_vm2 = vsmask.f32 (!%p161_p10), 3328  ;;  %v755_v3 = vld [vmem:[%s1153_s1 + $0x10] sm:$0xff] (!%p161_p10)  }
  0x12   : > { %s957_s30 = scalar_select %p105_p11, %s839_s14, %s107_s28  }
  0x13   : > { %662 = vmatpush1.bf16.msra.mxu1 (!%p161_p10), %v753_v0  ;;  %457 = vmatpush1.bf16.msra.mxu0 (!%p161_p10), %v753_v0  ;;  %vm207_vm3 = vsmask.f32 (!%p161_p10), 7440  ;;  %vm976_vm4 = vmor (!%p161_p10), %vm277_vm0, %vm278_vm1  ;;  %v756_v5 = vld [vmem:[%s1153_s1 + $0x18] sm:$0xff] (!%p161_p10)   ;;  %v757_v28 = vld [vmem:[%s1153_s1 + $0x20] sm:$0xff] (!%p161_p10)   ;;  %s862_s9 = smov (!%p161_p10), 80   ;;  %s863_s24 = smov (!%p161_p10), 40  }
  0x14   : > { %653 = vmatprep.subr.bf16.mxu1 (!%p161_p10), %v861_v1  ;;  %458 = vmatprep.subr.bf16.mxu0 (!%p161_p10), %v861_v1  ;;  %vm1030_vm5 = vmor (!%p161_p10), %vm206_vm2, %vm207_vm3  ;;  %v758_v54 = vld [vmem:[%s1153_s1 + $0x28] sm:$0xff] (!%p161_p10)   ;;  %v759_v62 = vld [vmem:[%s1153_s1 + $0x30] sm:$0xff] (!%p161_p10)   ;;  %vm451_vm6 = vcmask (!%p161_p10), 261120   ;;  %vm345_vm7 = vcmask (!%p161_p10), 326656   ;;  %vm357_vm8 = vcmask (!%p161_p10), 982016   ;;  %vm352_vm9 = vcmask (!%p161_p10), 654336  }
  0x15   : > { %s865_s8 = smov (!%p161_p10), [#allocation2]  }
  0x17   : > { %663 = vmatpush1.bf16.msra.mxu1 (!%p161_p10), %v754_v2  ;;  %459 = vmatpush1.bf16.msra.mxu0 (!%p161_p10), %v754_v2 }
  0x18   : > { %s189_s6 = scalar_select %p188_p12, %s847_s16, 1  ;;  %654 = vmatprep.subr.bf16.mxu1 %v861_v1  ;;  %460 = vmatprep.subr.bf16.mxu0 %v861_v1 }
  0x19   : > { %s191_s7 = scalar_select %p190_p13, %s843_s15, 1 }
  0x1a   : > { %s673_s10 = smul.u32 20, %s189_s6 }
  0x1b   : > { %s672_s11 = smul.u32 10, %s191_s7  ;;  %664 = vmatpush1.bf16.msra.mxu1 %v755_v3  ;;  %461 = vmatpush1.bf16.msra.mxu0 %v755_v3 }
  0x1c   : > { %655 = vmatprep.subr.bf16.mxu1 %v861_v1  ;;  %462 = vmatprep.subr.bf16.mxu0 %v861_v1 }
  0x1d   : > { %s194_s20 = sadd.s32 %s673_s10, %s672_s11  ;;  %s648_s10 = sshll.u32 %s847_s16, 3 }
  0x1e   : > { %s616_s27 = sshll.u32 %s194_s20, 2 }
  0x1f   : > { %s985_s4 = scalar_lea.vmem %s1152_s0, %s616_s27  ;;  %665 = vmatpush1.bf16.msra.mxu1 %v756_v5  ;;  %463 = vmatpush1.bf16.msra.mxu0 %v756_v5  ;;  %s864_s27 = smov 120  }
  0x20   : > { %v202_v6 = vld [vmem:[%s985_s4 + $0x4] sm:$0x1]  ;;  %v203_v7 = vld [vmem:[%s985_s4 + $0xc] sm:$0x1]  ;;  %v265_v8 = vld [vmem:[%s985_s4] sm:$0xe]  ;;  %656 = vmatprep.subr.bf16.mxu1 %v861_v1  ;;  %464 = vmatprep.subr.bf16.mxu0 %v861_v1 }
  0x21   : > { %v266_v9 = vld [vmem:[%s985_s4 + $0x8] sm:$0xe]  ;;  %v617_v10 = vrot.slane %v265_v8, 9  ;;  %v282_v11 = vrot.slane %v202_v6, 5  ;;  %v286_v12 = vrot.slane %v203_v7, 5  ;;  %v219_v13 = vshll.u32 %v202_v6, 16 }
  0x22   : > { %v618_v14 = vrot.slane %v266_v9, 9  ;;  %v995_v15 = vld [vmem:[%s985_s4] sm:$0xf]  ;;  %v998_v16 = vld [vmem:[%s985_s4 + $0x8] sm:$0xf]  ;;  %v233_v17 = vshll.u32 %v203_v7, 16 }
  0x23   : > { %v283_v18 = vsel %vm976_vm4, %v617_v10, %v282_v11  ;;  %v210_v19 = vshrl.u32 %v995_v15, 16  ;;  %v213_v20 = vshll.u32 %v995_v15, 16  ;;  %v221_v21 = vrot.slane %v219_v13, 5  ;;  %v204_v22 = vld [vmem:[%s985_s4 + $0x14] sm:$0x1]  ;;  %666 = vmatpush1.bf16.msra.mxu1 %v757_v28  ;;  %465 = vmatpush1.bf16.msra.mxu0 %v757_v28 }
  0x24   : > { %v287_v23 = vsel %vm976_vm4, %v618_v14, %v286_v12  ;;  %v224_v24 = vshrl.u32 %v998_v16, 16  ;;  %v227_v25 = vshll.u32 %v998_v16, 16  ;;  %v235_v26 = vrot.slane %v233_v17, 5  ;;  %v205_v27 = vld [vmem:[%s985_s4 + $0x1c] sm:$0x1]  ;;  %657 = vmatprep.subr.bf16.mxu1 %v861_v1  ;;  %466 = vmatprep.subr.bf16.mxu0 %v861_v1  ;;  %v762_v17 = vld [vmem:[%s1153_s1 + $0x40] sm:$0xff]  }
  0x25   : > { %v629_v29 = vcombine.low %v283_v18, %v287_v23  ;;  %v212_v30 = vrot.slane %v210_v19, 4  ;;  %v215_v31 = vrot.slane %v213_v20, 5  ;;  %v267_v32 = vld [vmem:[%s985_s4 + $0x10] sm:$0xe]  ;;  %v268_v33 = vld [vmem:[%s985_s4 + $0x18] sm:$0xe]  ;;  %v625_v34 = vcombine.low %v995_v15, %v998_v16 }
  0x26   : > { %v226_v35 = vrot.slane %v224_v24, 4  ;;  %v229_v36 = vrot.slane %v227_v25, 5  ;;  %v619_v37 = vrot.slane %v267_v32, 9  ;;  %v290_v38 = vrot.slane %v204_v22, 5  ;;  %v1020_v39 = vld [vmem:[%s985_s4 + $0x10] sm:$0xf] }
  0x27   : > { %327 = vrot.lane.b32.xlu1 %v629_v29, %s862_s9  ;;  %v216_v40 = vor.u32 %v215_v31, %v212_v30  ;;  %v620_v41 = vrot.slane %v268_v33, 9  ;;  %v294_v42 = vrot.slane %v205_v27, 5  ;;  %v1025_v43 = vld [vmem:[%s985_s4 + $0x18] sm:$0xf]  ;;  %v238_v44 = vshrl.u32 %v1020_v39, 16  ;;  %667 = vmatpush1.bf16.msra.mxu1 %v758_v54  ;;  %v764_v19 = vld [vmem:[%s1153_s1 + $0x48] sm:$0xff]  }
  0x28   : > { %v230_v46 = vor.u32 %v229_v36, %v226_v35  ;;  %v291_v47 = vsel %vm976_vm4, %v619_v37, %v290_v38  ;;  %v241_v48 = vshll.u32 %v1020_v39, 16  ;;  %v247_v49 = vshll.u32 %v204_v22, 16  ;;  %v751_v2 = vld [vmem:[%s985_s4 + $0x18] ss:$8 sps:$4 sm:$0xff]   ;;  %467 = vmatpush1.bf16.msra.mxu0 %v758_v54  ;;  %658 = vmatprep.subr.bf16.mxu1 %v861_v1  ;;  %v752_v18 = vld [vmem:[%s985_s4 + $0x8] ss:$8 sps:$4 sm:$0xff]  }
  0x29   : > { %v217_v50 = vrot.slane %v216_v40, 4  ;;  %v295_v51 = vsel %vm976_vm4, %v620_v41, %v294_v42  ;;  %v240_v52 = vrot.slane %v238_v44, 4  ;;  %v252_v53 = vshrl.u32 %v1025_v43, 16  ;;  %468 = vmatprep.subr.bf16.mxu0 %v861_v1  ;;  %v760_v12 = vld [vmem:[%s1153_s1 + $0x38] sm:$0xff]   ;;  %s185_s4 = sand.u32 1, %s835_s13  }
  0x2a   : > { %v231_v55 = vrot.slane %v230_v46, 4  ;;  %v630_v56 = vcombine.low %v291_v47, %v295_v51  ;;  %v243_v57 = vrot.slane %v241_v48, 5  ;;  %v255_v60 = vshll.u32 %v1025_v43, 16  ;;  %s615_s11 = sshll.u32 %s185_s4, 5  ;;  %v633_v15 = vld [vmem:[%s1154_s2] ss:$0 sm:$0xff] }
  0x2b   : > { %v222_v58 = vsel %vm1030_vm5, %v217_v50, %v221_v21  ;;  %v254_v59 = vrot.slane %v252_v53, 4  ;;  %v261_v61 = vshll.u32 %v205_v27, 16  ;;  %v626_v3 = vcombine.low %v1020_v39, %v1025_v43  ;;  %668 = vmatpush1.bf16.msra.mxu1 %v759_v62  ;;  %s1100_s6 = scalar_lea.sflag [#allocation3], %s185_s4 }
  0x2c   : > { %v236_v63 = vsel %vm1030_vm5, %v231_v55, %v235_v26  ;;  %329 = vrot.lane.b32.xlu1 %v630_v56, %s862_s9  ;;  %v244_v0 = vor.u32 %v243_v57, %v240_v52  ;;  %v249_v5 = vrot.slane %v247_v49, 5  ;;  %v257_v6 = vrot.slane %v255_v60, 5  ;;  %469 = vmatpush1.bf16.msra.mxu0 %v759_v62  ;;  %s647_s9 = sshll.u32 %s843_s15, 2 }
  0x2d   : > { %v627_v4 = vcombine.low %v222_v58, %v236_v63  ;;  %v263_v9 = vrot.slane %v261_v61, 5  ;;  %659 = vmatprep.subr.bf16.mxu1 %v861_v1  ;;  %470 = vmatprep.subr.bf16.mxu0 %v861_v1 }
  0x2e   : > { %v245_v7 = vrot.slane %v244_v0, 4  ;;  %v258_v8 = vor.u32 %v257_v6, %v254_v59 }
  0x2f   : > { %317 = vrot.lane.b32.xlu0 %v627_v4, %s863_s24  ;;  %669 = vmatpush1.bf16.msra.mxu1 %v760_v12 }
  0x30   : > { %343 = vrot.lane.b32.xlu1 %v751_v2, %s864_s27  ;;  %v250_v10 = vsel %vm1030_vm5, %v245_v7, %v249_v5  ;;  %v259_v11 = vrot.slane %v258_v8, 4  ;;  %471 = vmatpush1.bf16.msra.mxu0 %v760_v12 }
  0x31   : > { %660 = vmatprep.subr.bf16.mxu1 %v861_v1  ;;  %472 = vmatprep.subr.bf16.mxu0 %v861_v1 }
  0x32   : > { %v264_v13 = vsel %vm1030_vm5, %v259_v11, %v263_v9 }
  0x33   : > { %v628_v14 = vcombine.low %v250_v10, %v264_v13  ;;  %670 = vmatpush1.bf16.msra.mxu1 %v762_v17 }
  0x34   : > { %473 = vmatpush1.bf16.msra.mxu0 %v762_v17  ;;  %661 = vmatprep.subr.bf16.mxu1 %v861_v1 }
  0x35   : > { %319 = vrot.lane.b32.xlu0 %v628_v14, %s863_s24  ;;  %474 = vmatprep.subr.bf16.mxu0 %v861_v1  ;;  %s522_s24 = sadd.s32 %s648_s10, %s647_s9  ;;  %s769_s9 = sshll.u32 %s865_s8, 4  ;;  %s770_s9 = int_to_ptr.vmem [resolvable:$false] %s769_s9 }
  0x36   : > { %s649_s29 = sshll.u32 %s522_s24, 7  ;;  %s771_s10 = scalar_lea.vmem %s770_s9, 1024 }
  0x37   : > { %671 = vmatpush1.bf16.msra.mxu1 %v764_v19  ;;  %s1097_s5 = scalar_lea.hbm %s1155_s3, %s649_s29 }
  0x38   : > { %475 = vmatpush1.bf16.msra.mxu0 %v764_v19 }
  0x39   : > { %341 = vrot.lane.b32.xlu0 %v752_v18, %s864_s27  ;;  %s187_s27 = scalar_lea.vmem [#allocation2], %s615_s11 }
  0x3a   : > { %s525_s28 = sshll.u32 %s187_s27, 4  ;;  %s1090_s28 = int_to_ptr.vmem [resolvable:$true] %s525_s28 }
  0x3b   : > { %s765_s7 = scalar_lea.vmem %s1090_s28, 512  ;;  %p772_p4 = scmp.lt.s32.totalorder %s1090_s28, %s770_s9 }
  0x3c   : > { %p766_p0 = scmp.ne.s32.totalorder %s1090_s28, %s765_s7  ;;  %p773_p5 = scmp.lt.s32.totalorder %s771_s10, %s765_s7 }
  0x3e   : > { %p767_p1 = pnand %p766_p0, %p939_p3  ;;  %p774_p6 = por %p773_p5, %p772_p4 }
  0x40   : > { %p768_p2 = pneg %p767_p1 }
  0x42   : > { %p775_p7 = pnand %p774_p6, %p768_p2 }
  0x99   : > { %v328_v20 = vpop.permute.xlu1 %327 }
  0x9e   : > { %v330_v21 = vpop.permute.xlu1 %329 }
  0xa1   : > { %v318_v22 = vpop.permute.xlu0 %317 }
  0xa2   : > { %v344_v23 = vpop.permute.xlu1 %343  ;;  %v348_v25 = vsel %vm345_vm7, %v625_v34, %v318_v22 }
  0xa3   : > { %645 = vmatprep.mubr.msk.bf16.mxu1 %vm451_vm6, %v344_v23  ;;  %v354_v29 = vsel %vm352_vm9, %v348_v25, %v328_v20 }
  0xa7   : > { %v320_v24 = vpop.permute.xlu0 %319 }
  0xa8   : > { %v351_v1 = vsel %vm345_vm7, %v626_v3, %v320_v24 }
  0xa9   : > { %v356_v26 = vsel %vm352_vm9, %v351_v1, %v330_v21 }
  0xaa   : > { %v362_v27 = vsel %vm357_vm8, %v356_v26, %v344_v23 }
  0xab   : > { %497 = vmatmul.mubr.bf16.vlgmr.msra.gmra.mrb[0].mxu1 %v362_v27  ;;  %v342_v28 = vpop.permute.xlu0 %341 }
  0xac   : > { %644 = vmatprep.mubr.msk.bf16.mxu0 %vm451_vm6, %v342_v28  ;;  %v359_v30 = vsel %vm357_vm8, %v354_v29, %v342_v28 }
  0xad   : > { %489 = vmatmul.mubr.bf16.vlgmr.msra.gmra.mrb[0].mxu0 %v359_v30 }
 0x17e   : > { %v498_v16 = vpop.f32.mrb[0].mxu1 }
 0x17f   : > { %v499_v31 = vadd.f32 %v633_v15, %v498_v16  ;;  %v500_v32 = vpop.f32.mrb[1].mxu1 }
 0x180   : > { %v490_v33 = vpop.f32.mrb[0].mxu0  ;;  %v501_v34 = vpop.f32.mrb[2].mxu1 }
 0x181   : > { %507 = vst.msk [vmem:[%s187_s27 + $0x10] sm:$0xff] %vm451_vm6, %v499_v31  ;;  %v491_v35 = vadd.f32 %v633_v15, %v490_v33  ;;  %v502_v36 = vadd.f32 %v633_v15, %v501_v34  ;;  %v492_v37 = vpop.f32.mrb[1].mxu0  ;;  %v503_v38 = vpop.f32.mrb[3].mxu1 }
 0x182   : > { %v493_v39 = vpop.f32.mrb[2].mxu0 }
 0x183   : > { %505 = vst.msk [vmem:[%s187_s27] sm:$0xff] %vm451_vm6, %v491_v35  ;;  %508 = vst.msk [vmem:[%s187_s27 + $0x18] sm:$0xff] %vm451_vm6, %v502_v36  ;;  %v494_v40 = vadd.f32 %v633_v15, %v493_v39  ;;  %v495_v41 = vpop.f32.mrb[3].mxu0 }
 0x185   : > { %506 = vst.msk [vmem:[%s187_s27 + $0x8] sm:$0xff] %vm451_vm6, %v494_v40 }
 0x186   : > { %778 = shalt.err (!%p775_p7)
}
 0x187   : > { %s779_s4 = scalar_lea.hbm %s1097_s5, 512  ;;  %s783_s21 = scalar_lea.hbm %s1155_s3, 2048 }
 0x188   : > { %p780_p9 = scmp.ne.s32.totalorder %s1097_s5, %s779_s4  ;;  %p784_p12 = scmp.lt.u32.totalorder %s1097_s5, %s1155_s3 }
 0x189   : > { %p785_p13 = scmp.lt.u32.totalorder %s783_s21, %s779_s4  ;;  %p787_p1 = scmp.lt.u32.totalorder %s779_s4, %s1097_s5 }
 0x18a   : > { %p781_p10 = pnand %p780_p9, %p939_p3 }
 0x18b   : > { %p786_p0 = por %p785_p13, %p784_p12 }
 0x18c   : > { %p782_p11 = pneg %p781_p10 }
 0x18d   : > { %p788_p2 = por %p787_p1, %p786_p0 }
 0x18f   : > { %p789_p4 = pnand %p788_p2, %p782_p11 }
 0x191   : > { %792 = shalt.err (!%p789_p4)
}
 0x192   : > { %s866_s29 = smov 128   ;;  %s867_s15 = smov 8  }
 0x193   : > { %674 = dma.vmem_to_hbm [thread:$0]  (%p939_p3), %s1090_s28, 512, %s1097_s5, %s1100_s6, %s866_s29, %s866_s29, %s867_s15  }
 0x194 PF: > { %p680_p5 = scmp.ge.s32.totalorder %s859_s19, 2  ;;  %s540_s16 = sand.u32 1, %s831_s12  }
 0x195   : > { %s541_s7 = scalar_lea.sflag [#allocation3], %s540_s16 }
 0x196   : > { %p677_p6 = pnand %p680_p5, %p948_p8 }
 0x198   : > { %826 = dma.done.wait (!%p677_p6), %s541_s7, 512  }
 0x199   : > { %828 = vsyncadd (!%p677_p6), %s541_s7, 4294966784  ;;  %s16_s19 = sadd.s32 1, %s859_s19   ;;  %s1162_s12 = smov %s835_s13 }
 0x19a   : > { %p13_p7 = scmp.ge.s32.totalorder %s16_s19, 6   ;;  %s1163_s13 = smov %s839_s14 }
 0x19b   : > { %s1164_s14 = smov %s957_s30  ;;  %s1165_s15 = smov %s851_s17 }
 0x19c   : > { %s1166_s16 = smov %s855_s18  ;;  %s1167_s17 = smov %s1170_s22 }
 0x19d   : > { %s1168_s18 = smov %s1174_s23  ;;  %15 = sbr.rel (!%p13_p7) target bundleno = 5 (0x5), region = 68 }
 0x1a4   :  { %546 = vsyncpa [#allocation3], 1 }
 0x1a5   :  { %548 = vsyncpa [#allocation3 + $0x1], 1 }

</bundles_post_ra>
